<compile_context>
chip_gen: v7x
topology: tpu7x:2x2x1
jax: 0.10.0
libtpu: 0.0.40
codegen_flags: <defaults>
</compile_context>

<pallas_src>
import functools

import jax
import jax.numpy as jnp
from jax.experimental import pallas as pl
from jax.experimental.pallas import tpu as pltpu


# ---------------------------------------------------------------------------
# Kernel
# ---------------------------------------------------------------------------
def _shift_rows(x2d, direction, H):
    """Shift rows of a (Bt*H, K) matrix by one within each H-row batch element.

    direction=+1: row r receives original row r-1 (zeros at each batch's row 0)
    direction=-1: row r receives original row r+1 (zeros at each batch's row H-1)
    """
    R, K = x2d.shape
    z = jnp.zeros((1, K), x2d.dtype)
    if direction > 0:
        y = jnp.concatenate([z, x2d[:-1, :]], axis=0)
        boundary = 0
    else:
        y = jnp.concatenate([x2d[1:, :], z], axis=0)
        boundary = H - 1
    if R != H:
        # Multiple batch elements stacked in this block: zero rows that crossed
        # a batch boundary during the shift.
        r = jax.lax.broadcasted_iota(jnp.int32, (R, 1), 0)
        y = jnp.where((r % H) != boundary, y, jnp.zeros_like(y))
    return y


def _cnn_block_kernel(x_ref, bw1_ref, b1_ref, bw2_ref, b2_ref, bws_ref, bs_ref,
                      o_ref, *, skip_final_activation):
    # x_ref  : (Bt, H, W*Cin)           channels-innermost input rows
    # bw1_ref: (3, W*Cin,  W*Cout)      banded conv1 weights (one per kh)
    # bw2_ref: (3, W*Cout, W*Cout)      banded conv2 weights (one per kh)
    # bws_ref: (W*Cin, W*Cout)          block-diagonal 1x1 skip weights
    # b*_ref : (1, W*Cout)              biases tiled along W (lane-dense)
    # o_ref  : (Bt, H, W*Cout)
    Bt, H, KC = x_ref.shape
    N = o_ref.shape[2]
    R = Bt * H
    f32 = jnp.float32

    x = x_ref[...].reshape(R, KC)            # layout-free merge (H % 8 == 0)
    x_dn = _shift_rows(x, +1, H)             # row h-1 (zero-padded)
    x_up = _shift_rows(x, -1, H)             # row h+1 (zero-padded)

    # ---- conv1 (3x3, pad=1) + bias + ReLU: 3 lane-dense matmuls -------------
    h1 = (jnp.dot(x_dn, bw1_ref[0], preferred_element_type=f32)
          + jnp.dot(x,    bw1_ref[1], preferred_element_type=f32)
          + jnp.dot(x_up, bw1_ref[2], preferred_element_type=f32)
          + b1_ref[...].astype(f32))
    h1 = jnp.maximum(h1, 0.0)                # (R, W*Cout), full-lane VPU op

    # ---- conv2 (3x3, pad=1) + bias ------------------------------------------
    h1c = h1.astype(x.dtype)                 # matmul operand dtype (f32/bf16)
    h1_dn = _shift_rows(h1c, +1, H)
    h1_up = _shift_rows(h1c, -1, H)
    out = (jnp.dot(h1_dn, bw2_ref[0], preferred_element_type=f32)
           + jnp.dot(h1c,  bw2_ref[1], preferred_element_type=f32)
           + jnp.dot(h1_up, bw2_ref[2], preferred_element_type=f32)
           # ---- 1x1 skip conv on the original input + biases ---------------
           + jnp.dot(x, bws_ref[...], preferred_element_type=f32)
           + b2_ref[...].astype(f32)
           + bs_ref[...].astype(f32))

    if not skip_final_activation:
        out = jnp.maximum(out, 0.0)

    o_ref[...] = out.reshape(Bt, H, N).astype(o_ref.dtype)


# ---------------------------------------------------------------------------
# Weight preprocessing (plain JAX, one-shot; folds under jit)
# ---------------------------------------------------------------------------
def _banded_conv_weights(w_hwio, W):
    """(3, 3, Ci, Co) conv weights -> (3, W*Ci, W*Co) banded matmul weights.

    Band[kh][wi*Ci + ci, wo*Co + co] = sum_kw w[kh, kw, ci, co] * [wi == wo+kw-1]
    which realizes the kw taps AND the padding=1 zero padding along W.
    """
    KH, KW, Ci, Co = w_hwio.shape
    wi = jnp.arange(W)[:, None]   # input pixel index
    wo = jnp.arange(W)[None, :]   # output pixel index
    bands = []
    for kh in range(KH):
        acc = jnp.zeros((W, Ci, W, Co), w_hwio.dtype)
        for kw in range(KW):
            sel = (wi == wo + (kw - 1)).astype(w_hwio.dtype)      # (W, W)
            acc = acc + sel[:, None, :, None] * w_hwio[kh, kw][None, :, None, :]
        bands.append(acc.reshape(W * Ci, W * Co))
    return jnp.stack(bands, axis=0)


def _banded_skip_weights(ws, W):
    """(Ci, Co) 1x1 conv weights -> block-diagonal (W*Ci, W*Co)."""
    Ci, Co = ws.shape
    eye = jnp.eye(W, dtype=ws.dtype)
    return (eye[:, None, :, None] * ws[None, :, None, :]).reshape(W * Ci, W * Co)


# ---------------------------------------------------------------------------
# Wrapper
# ---------------------------------------------------------------------------
def cnn_block_pallas(x_nchw, params, *, skip_final_activation=False,
                     batch_block=1, compute_dtype=jnp.float32):
    """x_nchw: (B, Cin, H, W) float32.  Returns (B, Cout, H, W) float32."""
    w1, b1, w2, b2, ws, bs = params           # w1/w2 in HWIO, ws (Cin, Cout)
    B, Cin, H, W = x_nchw.shape
    Cout = w1.shape[-1]
    if B % batch_block != 0:
        raise ValueError("batch_block must divide B")
    Bt = batch_block
    NC_IN, NC_OUT = W * Cin, W * Cout

    # Single layout change NCHW -> (B, H, W*Cin) channels-innermost.  The
    # module contract is NCHW; callers already holding NHWC can skip this.
    x2d = jnp.transpose(x_nchw, (0, 2, 3, 1)).reshape(B, H, NC_IN)
    x2d = x2d.astype(compute_dtype)

    bw1 = _banded_conv_weights(w1, W).astype(compute_dtype)   # (3, W*Cin,  W*Cout)
    bw2 = _banded_conv_weights(w2, W).astype(compute_dtype)   # (3, W*Cout, W*Cout)
    bws = _banded_skip_weights(ws, W).astype(compute_dtype)   # (W*Cin, W*Cout)
    b1t = jnp.tile(b1, W).reshape(1, NC_OUT).astype(jnp.float32)
    b2t = jnp.tile(b2, W).reshape(1, NC_OUT).astype(jnp.float32)
    bst = jnp.tile(bs, W).reshape(1, NC_OUT).astype(jnp.float32)

    kernel = functools.partial(_cnn_block_kernel,
                               skip_final_activation=skip_final_activation)

    # NOTE: for very large H*W*C (v7x 64 MiB VMEM) this block shape would be
    # tiled into H-strips with a 1-row halo; unnecessary at these sizes.
    out2d = pl.pallas_call(
        kernel,
        out_shape=jax.ShapeDtypeStruct((B, H, NC_OUT), jnp.float32),
        grid_spec=pltpu.PrefetchScalarGridSpec(
            num_scalar_prefetch=0,
            grid=(B // Bt,),
            in_specs=[
                pl.BlockSpec((Bt, H, NC_IN), lambda b: (b, 0, 0)),
                pl.BlockSpec((3, NC_IN, NC_OUT), lambda b: (0, 0, 0)),
                pl.BlockSpec((1, NC_OUT), lambda b: (0, 0)),
                pl.BlockSpec((3, NC_OUT, NC_OUT), lambda b: (0, 0, 0)),
                pl.BlockSpec((1, NC_OUT), lambda b: (0, 0)),
                pl.BlockSpec((NC_IN, NC_OUT), lambda b: (0, 0)),
                pl.BlockSpec((1, NC_OUT), lambda b: (0, 0)),
            ],
            out_specs=pl.BlockSpec((Bt, H, NC_OUT), lambda b: (b, 0, 0)),
        ),
        compiler_params=pltpu.CompilerParams(
            dimension_semantics=("parallel",)),
    )(x2d, bw1, b1t, bw2, b2t, bws, bst)

    # Back to NCHW for the PyTorch-equivalent interface.
    return jnp.transpose(out2d.reshape(B, H, W, Cout), (0, 3, 1, 2))


# ---------------------------------------------------------------------------
# Pure-JAX reference (lax.conv, NCHW / OIHW like torch) and parameter init
# ---------------------------------------------------------------------------
def cnn_block_reference(x_nchw, params, *, skip_final_activation=False):
    w1, b1, w2, b2, ws, bs = params
    w1_oihw = jnp.transpose(w1, (3, 2, 0, 1))
    w2_oihw = jnp.transpose(w2, (3, 2, 0, 1))
    ws_oihw = jnp.transpose(ws, (1, 0)).reshape(ws.shape[1], ws.shape[0], 1, 1)

    def conv(x, w, b, pad):
        y = jax.lax.conv_general_dilated(
            x, w, window_strides=(1, 1), padding=[(pad, pad), (pad, pad)],
            dimension_numbers=("NCHW", "OIHW", "NCHW"))
        return y + b.reshape(1, -1, 1, 1)

    h = jax.nn.relu(conv(x_nchw, w1_oihw, b1, 1))
    h = conv(h, w2_oihw, b2, 1)
    h = h + conv(x_nchw, ws_oihw, bs, 0)
    if not skip_final_activation:
        h = jax.nn.relu(h)
    return h


def init_params(key, in_channels, out_channels):
    """Deterministic parameter init (shapes match nn.Conv2d in the module)."""
    k = jax.random.split(key, 6)
    scale1 = 1.0 / jnp.sqrt(in_channels * 9.0)
    scale2 = 1.0 / jnp.sqrt(out_channels * 9.0)
    scales = 1.0 / jnp.sqrt(float(in_channels))
    # Stored in HWIO layout for the kernel-side band construction.
    w1 = jax.random.uniform(k[0], (3, 3, in_channels, out_channels),
                            jnp.float32, -scale1, scale1)
    b1 = jax.random.uniform(k[1], (out_channels,), jnp.float32, -scale1, scale1)
    w2 = jax.random.uniform(k[2], (3, 3, out_channels, out_channels),
                            jnp.float32, -scale2, scale2)
    b2 = jax.random.uniform(k[3], (out_channels,), jnp.float32, -scale2, scale2)
    ws = jax.random.uniform(k[4], (in_channels, out_channels),
                            jnp.float32, -scales, scales)
    bs = jax.random.uniform(k[5], (out_channels,), jnp.float32, -scales, scales)
    return (w1, b1, w2, b2, ws, bs)


if __name__ == "__main__":
    key = jax.random.PRNGKey(0)
    k_x, k_p = jax.random.split(key)

    B, Cin, Cout, H, W = 2, 4, 8, 16, 16
    x = jax.random.normal(k_x, (B, Cin, H, W), jnp.float32)
    params = init_params(k_p, Cin, Cout)

    out = cnn_block_pallas(x, params, skip_final_activation=False)
    out = jax.block_until_ready(out)

    ref = cnn_block_reference(x, params, skip_final_activation=False)
    ref = jax.block_until_ready(ref)

    assert out.shape == (B, Cout, H, W), out.shape
    assert jnp.allclose(out, ref, atol=1e-4, rtol=1e-4), (
        float(jnp.max(jnp.abs(out - ref))))

    print("KERNEL_OK")
</pallas_src>

<mosaic_0001>
module attributes {stable_mosaic.version = 11 : i64} {
  func.func @_cnn_block_kernel(%arg0: i32, %arg1: memref<1x16x64xf32, #tpu.memory_space<vmem>>, %arg2: memref<3x64x128xf32, #tpu.memory_space<vmem>>, %arg3: memref<1x128xf32, #tpu.memory_space<vmem>>, %arg4: memref<3x128x128xf32, #tpu.memory_space<vmem>>, %arg5: memref<1x128xf32, #tpu.memory_space<vmem>>, %arg6: memref<64x128xf32, #tpu.memory_space<vmem>>, %arg7: memref<1x128xf32, #tpu.memory_space<vmem>>, %arg8: memref<1x16x128xf32, #tpu.memory_space<vmem>>) attributes {dimension_semantics = [#tpu.dimension_semantics<parallel>], iteration_bounds = array<i64: 2>, scalar_prefetch = 0 : i64, scratch_operands = 0 : i64, tpu.core_type = #tpu.core_type<tc>, window_params = [{transform_indices = @transform_0, window_bounds = array<i64: 1, 16, 64>}, {pipeline_mode = #tpu.pipeline_mode<synchronous>, transform_indices = @transform_1, window_bounds = array<i64: 3, 64, 128>}, {pipeline_mode = #tpu.pipeline_mode<synchronous>, transform_indices = @transform_2, window_bounds = array<i64: 1, 128>}, {pipeline_mode = #tpu.pipeline_mode<synchronous>, transform_indices = @transform_3, window_bounds = array<i64: 3, 128, 128>}, {pipeline_mode = #tpu.pipeline_mode<synchronous>, transform_indices = @transform_4, window_bounds = array<i64: 1, 128>}, {pipeline_mode = #tpu.pipeline_mode<synchronous>, transform_indices = @transform_5, window_bounds = array<i64: 64, 128>}, {pipeline_mode = #tpu.pipeline_mode<synchronous>, transform_indices = @transform_6, window_bounds = array<i64: 1, 128>}, {transform_indices = @transform_7, window_bounds = array<i64: 1, 16, 128>}]} {
    %c0 = arith.constant 0 : index
    %c0_0 = arith.constant 0 : index
    %c0_1 = arith.constant 0 : index
    %0 = vector.load %arg1[%c0, %c0_0, %c0_1] : memref<1x16x64xf32, #tpu.memory_space<vmem>>, vector<1x16x64xf32>
    %1 = vector.shape_cast %0 : vector<1x16x64xf32> to vector<16x64xf32>
    %cst = arith.constant 0.000000e+00 : f32
    %2 = vector.broadcast %cst : f32 to vector<1x64xf32>
    %3 = vector.extract_strided_slice %1 {offsets = [0, 0], sizes = [15, 64], strides = [1, 1]} : vector<16x64xf32> to vector<15x64xf32>
    %4 = tpu.concatenate %2, %3 in 0 : vector<1x64xf32>, vector<15x64xf32> -> vector<16x64xf32>
    %cst_2 = arith.constant 0.000000e+00 : f32
    %5 = vector.broadcast %cst_2 : f32 to vector<1x64xf32>
    %6 = vector.extract_strided_slice %1 {offsets = [1, 0], sizes = [15, 64], strides = [1, 1]} : vector<16x64xf32> to vector<15x64xf32>
    %7 = tpu.concatenate %6, %5 in 0 : vector<15x64xf32>, vector<1x64xf32> -> vector<16x64xf32>
    %c0_3 = arith.constant 0 : index
    %c0_4 = arith.constant 0 : index
    %c0_5 = arith.constant 0 : index
    %8 = vector.load %arg2[%c0_3, %c0_4, %c0_5] : memref<3x64x128xf32, #tpu.memory_space<vmem>>, vector<1x64x128xf32>
    %9 = vector.shape_cast %8 : vector<1x64x128xf32> to vector<64x128xf32>
    %cst_6 = arith.constant dense<0.000000e+00> : vector<16x128xf32>
    %10 = tpu.matmul %4, %9, %cst_6 {dimension_numbers = #tpu.dot_dimension_numbers<[1], [0], [0], [1], [0, 0, 1, 1], [], []>} : vector<16x64xf32>, vector<64x128xf32>, vector<16x128xf32> -> vector<16x128xf32>
    %c1 = arith.constant 1 : index
    %c0_7 = arith.constant 0 : index
    %c0_8 = arith.constant 0 : index
    %11 = vector.load %arg2[%c1, %c0_7, %c0_8] : memref<3x64x128xf32, #tpu.memory_space<vmem>>, vector<1x64x128xf32>
    %12 = vector.shape_cast %11 : vector<1x64x128xf32> to vector<64x128xf32>
    %cst_9 = arith.constant dense<0.000000e+00> : vector<16x128xf32>
    %13 = tpu.matmul %1, %12, %cst_9 {dimension_numbers = #tpu.dot_dimension_numbers<[1], [0], [0], [1], [0, 0, 1, 1], [], []>} : vector<16x64xf32>, vector<64x128xf32>, vector<16x128xf32> -> vector<16x128xf32>
    %14 = arith.addf %10, %13 : vector<16x128xf32>
    %c2 = arith.constant 2 : index
    %c0_10 = arith.constant 0 : index
    %c0_11 = arith.constant 0 : index
    %15 = vector.load %arg2[%c2, %c0_10, %c0_11] : memref<3x64x128xf32, #tpu.memory_space<vmem>>, vector<1x64x128xf32>
    %16 = vector.shape_cast %15 : vector<1x64x128xf32> to vector<64x128xf32>
    %cst_12 = arith.constant dense<0.000000e+00> : vector<16x128xf32>
    %17 = tpu.matmul %7, %16, %cst_12 {dimension_numbers = #tpu.dot_dimension_numbers<[1], [0], [0], [1], [0, 0, 1, 1], [], []>} : vector<16x64xf32>, vector<64x128xf32>, vector<16x128xf32> -> vector<16x128xf32>
    %18 = arith.addf %14, %17 : vector<16x128xf32>
    %c0_13 = arith.constant 0 : index
    %c0_14 = arith.constant 0 : index
    %19 = vector.load %arg3[%c0_13, %c0_14] : memref<1x128xf32, #tpu.memory_space<vmem>>, vector<1x128xf32>
    %20 = vector.broadcast %19 : vector<1x128xf32> to vector<16x128xf32>
    %21 = arith.addf %18, %20 : vector<16x128xf32>
    %cst_15 = arith.constant 0.000000e+00 : f32
    %22 = vector.broadcast %cst_15 : f32 to vector<16x128xf32>
    %23 = arith.maximumf %21, %22 : vector<16x128xf32>
    %cst_16 = arith.constant 0.000000e+00 : f32
    %24 = vector.broadcast %cst_16 : f32 to vector<1x128xf32>
    %25 = vector.extract_strided_slice %23 {offsets = [0, 0], sizes = [15, 128], strides = [1, 1]} : vector<16x128xf32> to vector<15x128xf32>
    %26 = tpu.concatenate %24, %25 in 0 : vector<1x128xf32>, vector<15x128xf32> -> vector<16x128xf32>
    %cst_17 = arith.constant 0.000000e+00 : f32
    %27 = vector.broadcast %cst_17 : f32 to vector<1x128xf32>
    %28 = vector.extract_strided_slice %23 {offsets = [1, 0], sizes = [15, 128], strides = [1, 1]} : vector<16x128xf32> to vector<15x128xf32>
    %29 = tpu.concatenate %28, %27 in 0 : vector<15x128xf32>, vector<1x128xf32> -> vector<16x128xf32>
    %c0_18 = arith.constant 0 : index
    %c0_19 = arith.constant 0 : index
    %c0_20 = arith.constant 0 : index
    %30 = vector.load %arg4[%c0_18, %c0_19, %c0_20] : memref<3x128x128xf32, #tpu.memory_space<vmem>>, vector<1x128x128xf32>
    %31 = vector.shape_cast %30 : vector<1x128x128xf32> to vector<128x128xf32>
    %cst_21 = arith.constant dense<0.000000e+00> : vector<16x128xf32>
    %32 = tpu.matmul %26, %31, %cst_21 {dimension_numbers = #tpu.dot_dimension_numbers<[1], [0], [0], [1], [0, 0, 1, 1], [], []>} : vector<16x128xf32>, vector<128x128xf32>, vector<16x128xf32> -> vector<16x128xf32>
    %c1_22 = arith.constant 1 : index
    %c0_23 = arith.constant 0 : index
    %c0_24 = arith.constant 0 : index
    %33 = vector.load %arg4[%c1_22, %c0_23, %c0_24] : memref<3x128x128xf32, #tpu.memory_space<vmem>>, vector<1x128x128xf32>
    %34 = vector.shape_cast %33 : vector<1x128x128xf32> to vector<128x128xf32>
    %cst_25 = arith.constant dense<0.000000e+00> : vector<16x128xf32>
    %35 = tpu.matmul %23, %34, %cst_25 {dimension_numbers = #tpu.dot_dimension_numbers<[1], [0], [0], [1], [0, 0, 1, 1], [], []>} : vector<16x128xf32>, vector<128x128xf32>, vector<16x128xf32> -> vector<16x128xf32>
    %36 = arith.addf %32, %35 : vector<16x128xf32>
    %c2_26 = arith.constant 2 : index
    %c0_27 = arith.constant 0 : index
    %c0_28 = arith.constant 0 : index
    %37 = vector.load %arg4[%c2_26, %c0_27, %c0_28] : memref<3x128x128xf32, #tpu.memory_space<vmem>>, vector<1x128x128xf32>
    %38 = vector.shape_cast %37 : vector<1x128x128xf32> to vector<128x128xf32>
    %cst_29 = arith.constant dense<0.000000e+00> : vector<16x128xf32>
    %39 = tpu.matmul %29, %38, %cst_29 {dimension_numbers = #tpu.dot_dimension_numbers<[1], [0], [0], [1], [0, 0, 1, 1], [], []>} : vector<16x128xf32>, vector<128x128xf32>, vector<16x128xf32> -> vector<16x128xf32>
    %40 = arith.addf %36, %39 : vector<16x128xf32>
    %c0_30 = arith.constant 0 : index
    %c0_31 = arith.constant 0 : index
    %41 = vector.load %arg6[%c0_30, %c0_31] : memref<64x128xf32, #tpu.memory_space<vmem>>, vector<64x128xf32>
    %cst_32 = arith.constant dense<0.000000e+00> : vector<16x128xf32>
    %42 = tpu.matmul %1, %41, %cst_32 {dimension_numbers = #tpu.dot_dimension_numbers<[1], [0], [0], [1], [0, 0, 1, 1], [], []>} : vector<16x64xf32>, vector<64x128xf32>, vector<16x128xf32> -> vector<16x128xf32>
    %43 = arith.addf %40, %42 : vector<16x128xf32>
    %c0_33 = arith.constant 0 : index
    %c0_34 = arith.constant 0 : index
    %44 = vector.load %arg5[%c0_33, %c0_34] : memref<1x128xf32, #tpu.memory_space<vmem>>, vector<1x128xf32>
    %45 = vector.broadcast %44 : vector<1x128xf32> to vector<16x128xf32>
    %46 = arith.addf %43, %45 : vector<16x128xf32>
    %c0_35 = arith.constant 0 : index
    %c0_36 = arith.constant 0 : index
    %47 = vector.load %arg7[%c0_35, %c0_36] : memref<1x128xf32, #tpu.memory_space<vmem>>, vector<1x128xf32>
    %48 = vector.broadcast %47 : vector<1x128xf32> to vector<16x128xf32>
    %49 = arith.addf %46, %48 : vector<16x128xf32>
    %cst_37 = arith.constant 0.000000e+00 : f32
    %50 = vector.broadcast %cst_37 : f32 to vector<16x128xf32>
    %51 = arith.maximumf %49, %50 : vector<16x128xf32>
    %52 = vector.shape_cast %51 : vector<16x128xf32> to vector<1x16x128xf32>
    %c0_38 = arith.constant 0 : index
    %c0_39 = arith.constant 0 : index
    %c0_40 = arith.constant 0 : index
    %53 = vector.load %arg8[%c0_38, %c0_39, %c0_40] : memref<1x16x128xf32, #tpu.memory_space<vmem>>, vector<1x16x128xf32>
    tpu.vector_store %arg8[%c0_38, %c0_39, %c0_40], %52 {strides = array<i32>} : memref<1x16x128xf32, #tpu.memory_space<vmem>>, vector<1x16x128xf32>,
    return
  }
  func.func @transform_0(%arg0: i32) -> (i32, i32, i32) {
    %c0_i32 = arith.constant 0 : i32
    %c0_i32_0 = arith.constant 0 : i32
    %c0_i32_1 = arith.constant 0 : i32
    return %arg0, %c0_i32, %c0_i32_0 : i32, i32, i32
  }
  func.func @transform_1(%arg0: i32) -> (i32, i32, i32) {
    %c0_i32 = arith.constant 0 : i32
    %c0_i32_0 = arith.constant 0 : i32
    %c0_i32_1 = arith.constant 0 : i32
    %c0_i32_2 = arith.constant 0 : i32
    return %c0_i32, %c0_i32_0, %c0_i32_1 : i32, i32, i32
  }
  func.func @transform_2(%arg0: i32) -> (i32, i32) {
    %c0_i32 = arith.constant 0 : i32
    %c0_i32_0 = arith.constant 0 : i32
    %c0_i32_1 = arith.constant 0 : i32
    return %c0_i32, %c0_i32_0 : i32, i32
  }
  func.func @transform_3(%arg0: i32) -> (i32, i32, i32) {
    %c0_i32 = arith.constant 0 : i32
    %c0_i32_0 = arith.constant 0 : i32
    %c0_i32_1 = arith.constant 0 : i32
    %c0_i32_2 = arith.constant 0 : i32
    return %c0_i32, %c0_i32_0, %c0_i32_1 : i32, i32, i32
  }
  func.func @transform_4(%arg0: i32) -> (i32, i32) {
    %c0_i32 = arith.constant 0 : i32
    %c0_i32_0 = arith.constant 0 : i32
    %c0_i32_1 = arith.constant 0 : i32
    return %c0_i32, %c0_i32_0 : i32, i32
  }
  func.func @transform_5(%arg0: i32) -> (i32, i32) {
    %c0_i32 = arith.constant 0 : i32
    %c0_i32_0 = arith.constant 0 : i32
    %c0_i32_1 = arith.constant 0 : i32
    return %c0_i32, %c0_i32_0 : i32, i32
  }
  func.func @transform_6(%arg0: i32) -> (i32, i32) {
    %c0_i32 = arith.constant 0 : i32
    %c0_i32_0 = arith.constant 0 : i32
    %c0_i32_1 = arith.constant 0 : i32
    return %c0_i32, %c0_i32_0 : i32, i32
  }
  func.func @transform_7(%arg0: i32) -> (i32, i32, i32) {
    %c0_i32 = arith.constant 0 : i32
    %c0_i32_0 = arith.constant 0 : i32
    %c0_i32_1 = arith.constant 0 : i32
    return %arg0, %c0_i32, %c0_i32_0 : i32, i32, i32
  }
}

</mosaic_0001>

<bundles_post_ra>
// kernel: tpu_custom_call.1
= control target key start
LH: loop header
LB: loop body
LE: loop exit
PB: predicated region body
PF: predicated region fallthrough
CT: control target
= control target key end

     0   :  { %12 = vsyncpa [#allocation3], 0  ;;  %s2267_s0 = inlined_call_operand.hbm [shape: f32[2,16,64], index: 0, kind: input, shape index: {}]   ;;  %s2268_s1 = inlined_call_operand.hbm [shape: f32[3,64,128], index: 1, kind: input, shape index: {}]   ;;  %s2269_s2 = inlined_call_operand.vmem [shape: f32[1,128], index: 2, kind: input, shape index: {}]   ;;  %s2270_s3 = inlined_call_operand.hbm [shape: f32[3,128,128], index: 3, kind: input, shape index: {}]   ;;  %s2271_s4 = inlined_call_operand.vmem [shape: f32[1,128], index: 4, kind: input, shape index: {}]   ;;  %s2272_s5 = inlined_call_operand.hbm [shape: f32[64,128], index: 5, kind: input, shape index: {}]   ;;  %s2273_s6 = inlined_call_operand.vmem [shape: f32[1,128], index: 6, kind: input, shape index: {}]   ;;  %s2274_s7 = inlined_call_operand.hbm [shape: f32[2,16,128], index: 7, kind: output, shape index: {}]  }
   0x1   :  { %14 = vsyncpa [#allocation3 + $0x1], 0 }
   0x2   :  { %15 = vsyncpa [#allocation6], 0 }
   0x3   :  { %16 = vsyncpa [#allocation9], 0 }
   0x4   :  { %17 = vsyncpa [#allocation4], 0 }
   0x5   :  { %19 = vsyncpa [#allocation4 + $0x1], 0  ;;  %s1951_s24 = smov 0   ;;  %s1953_s25 = smov 0  }
   0x6   :  { %s1955_s26 = smov 0   ;;  %s1957_s27 = smov 0  }
   0x7 LB: > { %s1972_s28 = sadd.s32 4294967295, %s1900_s27   ;;  %s1150_s29 = sadd.s32 4294967294, %s1900_s27   ;;  %s1900_s27 = sphi %s1957_s27, %s2300_s27   ;;  %s1896_s26 = sphi %s1955_s26, %s2299_s26   ;;  %s1892_s25 = sphi %s1953_s25, %s2298_s25   ;;  %s1888_s24 = sphi %s1951_s24, %s2297_s24  }
   0x8   : > { %p45_p0 = scmp.ne.s32.totalorder %s1892_s25, %s1888_s24  ;;  %p2275_p1 = scmp.eq.s32.totalorder %s1972_s28, 0 }
   0x9   : > { %p201_p3 = scmp.eq.s32.totalorder %s1150_s29, 1  ;;  %p1151_p5 = scmp.ge.s32.totalorder %s1900_s27, 1 }
   0xa   : > { %p1981_p4 = por %p2275_p1, %p45_p0  ;;  %p208_p7 = scmp.lt.s32.totalorder %s1900_s27, 3 }
   0xb   : > { %p1986_p6 = por %p201_p3, %p45_p0  ;;  %s1902_s10 = smov [#allocation5]  }
   0xc   : > { %s2279_s30 = scalar_select %p1981_p4, 1, 0 }
   0xd   : > { %s2280_s8 = scalar_select %p1986_p6, 1, 0 }
   0xe   : > { %p1991_p8 = pnand %p1151_p5, %p208_p7  ;;  %s220_s11 = sshll.u32 %s1902_s10, 4  ;;  %s1995_s11 = int_to_ptr.vmem [resolvable:$true] %s220_s11 }
   0xf   : > { %2281 = sst [smem:[#allocation15_spill]] %s2280_s8  ;;  %s1903_s13 = smov [#allocation7]  }
  0x10   : > { %s2282_s9 = scalar_select %p1991_p8, 1, 0 }
  0x11   : > { %p1647_p9 = pneg %p1991_p8  ;;  %s236_s14 = sshll.u32 %s1903_s13, 4  ;;  %s2006_s14 = int_to_ptr.vmem [resolvable:$true] %s236_s14 }
  0x12   : > { %s1904_s15 = smov [#allocation8]   ;;  %s1712_s19 = scalar_lea.hbm %s2268_s1, 3072 }
  0x13   : > { %p2002_p11 = pnand %p1647_p9, %p2275_p1  ;;  %s2008_s16 = sshll.u32 %s1904_s15, 4  ;;  %s253_s16 = int_to_ptr.vmem [resolvable:$true] %s2008_s16 }
  0x14   : > { %p1713_p12 = scmp.ne.s32.totalorder %s2268_s1, %s1712_s19  ;;  %p1719_p5 = scmp.lt.u32.totalorder %s1712_s19, %s2268_s1 }
  0x15   : > { %p2018_p13 = pneg %p2002_p11 }
  0x17   : > { %p1715_p0 = pnand %p2018_p13, %p1713_p12 }
  0x19   : > { %p1716_p3 = pneg %p1715_p0 }
  0x1b   : > { %p1721_p7 = pnand %p1719_p5, %p1716_p3 }
  0x1d   : > { %1724 = shalt.err (!%p1721_p7)
}
  0x1e   : > { %s1725_s10 = scalar_lea.vmem %s1995_s11, 3072  ;;  %p1733_p2 = scmp.lt.s32.totalorder %s1995_s11, %s1995_s11 }
  0x1f   : > { %p1726_p9 = scmp.ne.s32.totalorder %s1995_s11, %s1725_s10  ;;  %p1734_p6 = scmp.lt.s32.totalorder %s1725_s10, %s1725_s10 }
  0x21   : > { %p1728_p10 = pnand %p1726_p9, %p2018_p13  ;;  %p1735_p12 = por %p1734_p6, %p1733_p2 }
  0x23   : > { %p1729_p1 = pneg %p1728_p10 }
  0x25   : > { %p1736_p0 = pnand %p1735_p12, %p1729_p1 }
  0x27   : > { %1739 = shalt.err (!%p1736_p0)
}
  0x28   : > { %s1905_s13 = smov 128   ;;  %s1906_s15 = smov 8  }
  0x29   : > { %1650 = dma.hbm_to_vmem [thread:$0]  (!%p2002_p11), %s2268_s1, 3072, %s1995_s11, [#allocation6], %s1905_s13, %s1905_s13, %s1906_s15  }
  0x2a   : > { %s1740_s21 = scalar_lea.hbm %s2270_s3, 6144 }
  0x2b   : > { %p1741_p1 = scmp.ne.s32.totalorder %s2270_s3, %s1740_s21  ;;  %p1747_p10 = scmp.lt.u32.totalorder %s1740_s21, %s2270_s3 }
  0x2d   : > { %p1743_p2 = pnand %p1741_p1, %p2018_p13 }
  0x2f   : > { %p1744_p6 = pneg %p1743_p2 }
  0x31   : > { %p1749_p3 = pnand %p1747_p10, %p1744_p6 }
  0x33   : > { %1752 = shalt.err (!%p1749_p3)
}
  0x34   : > { %s1753_s11 = scalar_lea.vmem %s2006_s14, 6144  ;;  %p1761_p12 = scmp.lt.s32.totalorder %s2006_s14, %s2006_s14 }
  0x35   : > { %p1754_p5 = scmp.ne.s32.totalorder %s2006_s14, %s1753_s11  ;;  %p1762_p0 = scmp.lt.s32.totalorder %s1753_s11, %s1753_s11 }
  0x37   : > { %p1756_p7 = pnand %p1754_p5, %p2018_p13  ;;  %p1763_p1 = por %p1762_p0, %p1761_p12 }
  0x39   : > { %p1757_p9 = pneg %p1756_p7 }
  0x3b   : > { %p1764_p2 = pnand %p1763_p1, %p1757_p9 }
  0x3d   : > { %1767 = shalt.err (!%p1764_p2)
}
  0x3e   : > { %1653 = dma.hbm_to_vmem [thread:$0]  (!%p2002_p11), %s2270_s3, 6144, %s2006_s14, [#allocation6], %s1905_s13, %s1905_s13, %s1906_s15  }
  0x3f   : > { %s1768_s20 = scalar_lea.hbm %s2272_s5, 1024 }
  0x40   : > { %p1769_p6 = scmp.ne.s32.totalorder %s2272_s5, %s1768_s20  ;;  %p1775_p5 = scmp.lt.u32.totalorder %s1768_s20, %s2272_s5 }
  0x42   : > { %p1771_p10 = pnand %p1769_p6, %p2018_p13 }
  0x44   : > { %p1772_p3 = pneg %p1771_p10 }
  0x46   : > { %p1777_p7 = pnand %p1775_p5, %p1772_p3 }
  0x48   : > { %1780 = shalt.err (!%p1777_p7)
}
  0x49   : > { %s1781_s11 = scalar_lea.vmem %s253_s16, 1024  ;;  %p1789_p1 = scmp.lt.s32.totalorder %s253_s16, %s253_s16 }
  0x4a   : > { %p1782_p9 = scmp.ne.s32.totalorder %s253_s16, %s1781_s11  ;;  %p1790_p2 = scmp.lt.s32.totalorder %s1781_s11, %s1781_s11 }
  0x4c   : > { %p1784_p12 = pnand %p1782_p9, %p2018_p13  ;;  %p1791_p4 = por %p1790_p2, %p1789_p1 }
  0x4e   : > { %p1785_p0 = pneg %p1784_p12 }
  0x50   : > { %p1792_p8 = pnand %p1791_p4, %p1785_p0 }
  0x52   : > { %1795 = shalt.err (!%p1792_p8)
}
  0x53   : > { %1656 = dma.hbm_to_vmem [thread:$0]  (!%p2002_p11), %s2272_s5, 1024, %s253_s16, [#allocation9], %s1905_s13, %s1905_s13, %s1906_s15  }
  0x54   : > { %s2091_s22 = sadd.s32 1, %s1900_s27   ;;  %s32_s17 = sadd.s32 1, %s1896_s26 }
  0x55   : > { %s29_s12 = ssub.s32 %s1900_s27, %s2091_s22  ;;  %p39_p8 = scmp.ne.s32.totalorder %s1896_s26, %s1892_s25 }
  0x56   : > { %p30_p4 = scmp.eq.s32.totalorder %s29_s12, 0  ;;  %p40_p13 = scmp.eq.s32.totalorder %s1900_s27, 0 }
  0x57   : > { %p1668_p6 = scmp.lt.s32.totalorder %s1900_s27, 2  ;;  %p2285_p3 = scmp.eq.s32.totalorder %s1972_s28, 1 }
  0x58   : > { %s2101_s18 = scalar_select %p30_p4, %s1896_s26, %s32_s17  }
  0x59   : > { %p41_p10 = por %p40_p13, %p39_p8  ;;  %p2105_p5 = por %p2285_p3, %p39_p8 }
  0x5a   : > { %s269_s20 = sand.u32 1, %s1896_s26   ;;  %s1184_s21 = sshll.u32 %s1900_s27, 8 }
  0x5b   : > { %s1156_s16 = sshll.u32 %s269_s20, 4  ;;  %s2114_s10 = scalar_lea.hbm %s2267_s0, %s1184_s21 }
  0x5c   : > { %s273_s11 = scalar_lea.vmem [#allocation2], %s1156_s16  ;;  %p2116_p11 = pnand %p1668_p6, %p41_p10 }
  0x5d   : > { %s280_s14 = sshll.u32 %s273_s11, 4  ;;  %s2122_s12 = scalar_lea.sflag [#allocation3], %s269_s20  ;;  %s2120_s14 = int_to_ptr.vmem [resolvable:$true] %s280_s14 }
  0x5e   : > { %s1796_s17 = scalar_lea.hbm %s2114_s10, 256  ;;  %p1798_p9 = pneg %p2116_p11 }
  0x5f   : > { %p1797_p7 = scmp.ne.s32.totalorder %s2114_s10, %s1796_s17  ;;  %s1801_s23 = scalar_lea.hbm %s2267_s0, 512 }
  0x60   : > { %p1802_p1 = scmp.lt.u32.totalorder %s2114_s10, %s2267_s0  ;;  %p1803_p2 = scmp.lt.u32.totalorder %s1801_s23, %s1796_s17 }
  0x61   : > { %p1799_p12 = pnand %p1798_p9, %p1797_p7  ;;  %p1805_p8 = scmp.lt.u32.totalorder %s1796_s17, %s2114_s10 }
  0x62   : > { %p1804_p4 = por %p1803_p2, %p1802_p1 }
  0x63   : > { %p1800_p0 = pneg %p1799_p12 }
  0x64   : > { %p1806_p13 = por %p1805_p8, %p1804_p4 }
  0x66   : > { %p1807_p6 = pnand %p1806_p13, %p1800_p0 }
  0x68   : > { %1810 = shalt.err (!%p1807_p6)
}
  0x69   : > { %s1811_s20 = scalar_lea.vmem %s2120_s14, 256  ;;  %s1907_s21 = smov [#allocation2]  }
  0x6a   : > { %p1812_p10 = scmp.ne.s32.totalorder %s2120_s14, %s1811_s20  ;;  %s1816_s16 = sshll.u32 %s1907_s21, 4  ;;  %s1817_s16 = int_to_ptr.vmem [resolvable:$false] %s1816_s16 }
  0x6b   : > { %s1818_s29 = scalar_lea.vmem %s1817_s16, 512  ;;  %p1819_p12 = scmp.lt.s32.totalorder %s2120_s14, %s1817_s16 }
  0x6c   : > { %p1814_p3 = pnand %p1812_p10, %p1798_p9  ;;  %p1820_p1 = scmp.lt.s32.totalorder %s1818_s29, %s1811_s20 }
  0x6e   : > { %p1815_p7 = pneg %p1814_p3  ;;  %p1821_p2 = por %p1820_p1, %p1819_p12 }
  0x70   : > { %p1822_p4 = pnand %p1821_p2, %p1815_p7 }
  0x72   : > { %1825 = shalt.err (!%p1822_p4)
}
  0x73   : > { %1660 = dma.hbm_to_vmem [thread:$0]  (!%p2116_p11), %s2114_s10, 256, %s2120_s14, %s2122_s12, %s1905_s13, %s1905_s13, %s1906_s15  }
  0x74   : > { %p2288_p9 = scmp.ne.s32.totalorder %s2282_s9, 0 }
  0x75   : > { %s2156_s17 = sand.u32 (!%p2288_p9), 1, %s1892_s25   ;;  %p2289_p0 = scmp.ne.s32.totalorder (!%p2288_p9), %s2279_s30, 0 }
  0x76   : > { %292 = sbr.rel (%p2288_p9) target bundleno = 688 (0x2b0), region = 48  ;;  %s1160_s23 = sshll.u32 (!%p2288_p9), %s2156_s17, 4 }
  0x77   : > { %s295_s11 = scalar_lea.sflag (!%p2288_p9), [#allocation3], %s2156_s17  ;;  %s2162_s8 = scalar_lea.vmem (!%p2288_p9), [#allocation2], %s1160_s23 }
  0x7d   : > { %1871 = dma.done.wait (%p2289_p0), %s295_s11, 256  }
  0x7e   : > { %1873 = vsyncadd (%p2289_p0), %s295_s11, 4294967040  ;;  %p2290_p11 = scmp.eq.s32.totalorder %s1972_s28, 0 }
  0x80   : > { %1875 = dma.done.wait (%p2290_p11), [#allocation6], 9216   ;;  %p2291_p8 = pmov %p2290_p11 }
  0x82   : > { %1877 = vsyncadd (%p2291_p8), [#allocation6], 4294958080  ;;  %p2292_p13 = pmov %p2291_p8 }
  0x83   : > { %p2293_p6 = pmov %p2291_p8 }
  0x84   : > { %1879 = dma.done.wait (%p2292_p13), [#allocation9], 1024  }
  0x85   : > { %1881 = vsyncadd (%p2293_p6), [#allocation9], 4294966272  ;;  %v366_v0 = vld [vmem:[#allocation5 + $0x40] sm:$0xff]  ;;  %v367_v1 = vld [vmem:[#allocation5 + $0x48] sm:$0xff]  ;;  %vm374_vm0 = vcmask 523264   ;;  %vm345_vm1 = vcmask 1040384  }
  0x86   : > { %v368_v2 = vld [vmem:[#allocation5 + $0x50] sm:$0xff]  ;;  %v1461_v3 = vpack.c.bf16 %v367_v1, %v366_v0  ;;  %v369_v4 = vld [vmem:[#allocation5 + $0x58] sm:$0xff]  ;;  %v370_v6 = vld [vmem:[#allocation5 + $0x60] sm:$0xff]  ;;  %vm351_vm2 = vcmask 1046528   ;;  %s340_s12 = scalar_lea.vmem [#allocation10], %s1160_s23  ;;  %s1185_s21 = sshll.u32 %s1972_s28, 8 }
  0x87   : > { %v1465_v5 = vpack.c.bf16 %v369_v4, %v368_v2  ;;  %v371_v7 = vld [vmem:[#allocation5 + $0x68] sm:$0xff]  ;;  %v2177_v8 = vld [vmem:[%s2162_s8] sm:$0xff]  ;;  %v373_v11 = vld [vmem:[#allocation5 + $0x78] sm:$0xff]  ;;  %s1048_s20 = sshll.u32 %s340_s12, 4  ;;  %s2223_s11 = scalar_lea.hbm %s2274_s7, %s1185_s21  ;;  %s2218_s20 = int_to_ptr.vmem [resolvable:$true] %s1048_s20 }
  0x88   : > { %1462 = vmatprep.subr.bf16.mxu0 %v1461_v3  ;;  %1296 = vmatprep.mubr.msk.f32.mxu0 %vm374_vm0, %v2177_v8  ;;  %v1469_v9 = vpack.c.bf16 %v371_v7, %v370_v6  ;;  %v372_v10 = vld [vmem:[#allocation5 + $0x70] sm:$0xff]  ;;  %v650_v13 = vld [vmem:[#allocation7] sm:$0xff]  ;;  %v651_v14 = vld [vmem:[#allocation7 + $0x8] sm:$0xff]  ;;  %v346_v24 = vrot.slane %v2177_v8, 7  ;;  %v352_v49 = vrot.slane %v2177_v8, 1  ;;  %s1035_s23 = scalar_lea.sflag [#allocation4], %s2156_s17 }
  0x89   : > { %1464 = vmatpush3.bf16.msra.mxu0 %v1461_v3  ;;  %v1473_v12 = vpack.c.bf16 %v373_v11, %v372_v10  ;;  %v357_v15 = vld [vmem:[#allocation5] sm:$0xff]  ;;  %v358_v16 = vld [vmem:[#allocation5 + $0x8] sm:$0xff]  ;;  %v1541_v17 = vpack.c.bf16 %v651_v14, %v650_v13  ;;  %v652_v18 = vld [vmem:[#allocation7 + $0x10] sm:$0xff]  ;;  %s1908_s28 = smov [#allocation10]  }
  0x8a   : > { %1466 = vmatprep.subr.bf16.mxu0 %v1465_v5  ;;  %v653_v19 = vld [vmem:[#allocation7 + $0x18] sm:$0xff]  ;;  %v654_v21 = vld [vmem:[#allocation7 + $0x20] sm:$0xff]  ;;  %v655_v22 = vld [vmem:[#allocation7 + $0x28] sm:$0xff]  ;;  %v1477_v23 = vpack.c.bf16 %v358_v16, %v357_v15  ;;  %v350_v32 = vsel %vm345_vm1, 0.0, %v346_v24  ;;  %s1830_s30 = sshll.u32 %s1908_s28, 4  ;;  %s1831_s30 = int_to_ptr.vmem [resolvable:$false] %s1830_s30 }
  0x8b   : > { %1542 = vmatprep.subr.bf16.mxu1 %v1541_v17  ;;  %v1545_v20 = vpack.c.bf16 %v653_v19, %v652_v18  ;;  %v359_v25 = vld [vmem:[#allocation5 + $0x10] sm:$0xff]  ;;  %v360_v26 = vld [vmem:[#allocation5 + $0x18] sm:$0xff]  ;;  %v1549_v27 = vpack.c.bf16 %v655_v22, %v654_v21  ;;  %v361_v33 = vld [vmem:[#allocation5 + $0x20] sm:$0xff]  ;;  %s1832_s9 = scalar_lea.vmem %s1831_s30, 512  ;;  %p1833_p12 = scmp.lt.s32.totalorder %s2218_s20, %s1831_s30 }
  0x8c   : > { %1544 = vmatpush3.bf16.msra.mxu1 %v1541_v17  ;;  %v656_v28 = vld [vmem:[#allocation7 + $0x30] sm:$0xff]  ;;  %v657_v29 = vld [vmem:[#allocation7 + $0x38] sm:$0xff]  ;;  %v1481_v31 = vpack.c.bf16 %v360_v26, %v359_v25  ;;  %v362_v34 = vld [vmem:[#allocation5 + $0x28] sm:$0xff] }
  0x8d   : > { %1468 = vmatpush3.bf16.msra.mxu0 %v1465_v5  ;;  %1546 = vmatprep.subr.bf16.mxu1 %v1545_v20  ;;  %v2183_v30 = vld [vmem:[%s2162_s8 + $0x8] sm:$0xff]  ;;  %v1553_v35 = vpack.c.bf16 %v657_v29, %v656_v28  ;;  %v658_v36 = vld [vmem:[#allocation7 + $0x40] sm:$0xff]  ;;  %v1485_v38 = vpack.c.bf16 %v362_v34, %v361_v33  ;;  %v363_v39 = vld [vmem:[#allocation5 + $0x30] sm:$0xff]  ;;  %s1826_s8 = scalar_lea.vmem %s2218_s20, 256 }
  0x8e   : > { %1470 = vmatprep.subr.bf16.mxu0 %v1469_v9  ;;  %v659_v37 = vld [vmem:[#allocation7 + $0x48] sm:$0xff]  ;;  %v364_v40 = vld [vmem:[#allocation5 + $0x38] sm:$0xff]  ;;  %v660_v42 = vld [vmem:[#allocation7 + $0x50] sm:$0xff]  ;;  %v347_v48 = vrot.slane %v2183_v30, 7  ;;  %v353_v50 = vrot.slane %v2183_v30, 1  ;;  %p1827_p10 = scmp.ne.s32.totalorder %s2218_s20, %s1826_s8  ;;  %p1834_p1 = scmp.lt.s32.totalorder %s1832_s9, %s1826_s8 }
  0x8f   : > { %v1557_v41 = vpack.c.bf16 %v659_v37, %v658_v36  ;;  %v661_v43 = vld [vmem:[#allocation7 + $0x58] sm:$0xff]  ;;  %v1489_v44 = vpack.c.bf16 %v364_v40, %v363_v39  ;;  %v535_v45 = vld [vmem:[#allocation5 + $0x80] sm:$0xff]  ;;  %v536_v46 = vld [vmem:[#allocation5 + $0x88] sm:$0xff] }
  0x90   : > { %1548 = vmatpush3.bf16.msra.mxu1 %v1545_v20  ;;  %v1561_v47 = vpack.c.bf16 %v661_v43, %v660_v42  ;;  %v1493_v51 = vpack.c.bf16 %v536_v46, %v535_v45  ;;  %v537_v52 = vld [vmem:[#allocation5 + $0x90] sm:$0xff]  ;;  %v538_v53 = vld [vmem:[#allocation5 + $0x98] sm:$0xff]  ;;  %v348_v54 = vsel %vm345_vm1, %v346_v24, %v347_v48  ;;  %v354_v56 = vsel %vm351_vm2, %v352_v49, %v353_v50  ;;  %v539_v57 = vld [vmem:[#allocation5 + $0xa0] sm:$0xff]  ;;  %p1828_p3 = pnand %p1827_p10, %p2105_p5  ;;  %p1835_p2 = por %p1834_p1, %p1833_p12 }
  0x91   : > { %1472 = vmatpush3.bf16.msra.mxu0 %v1469_v9  ;;  %1550 = vmatprep.subr.bf16.mxu1 %v1549_v27  ;;  %v1497_v55 = vpack.c.bf16 %v538_v53, %v537_v52  ;;  %v540_v58 = vld [vmem:[#allocation5 + $0xa8] sm:$0xff]  ;;  %v541_v60 = vld [vmem:[#allocation5 + $0xb0] sm:$0xff]  ;;  %v542_v61 = vld [vmem:[#allocation5 + $0xb8] sm:$0xff]  ;;  %v356_v4 = vsel %vm351_vm2, %v353_v50, 0.0 }
  0x92   : > { %1474 = vmatprep.subr.bf16.mxu0 %v1473_v12  ;;  %v1501_v59 = vpack.c.bf16 %v540_v58, %v539_v57  ;;  %v1505_v62 = vpack.c.bf16 %v542_v61, %v541_v60  ;;  %v667_v63 = vld [vmem:[#allocation7 + $0x80] sm:$0xff]  ;;  %v668_v0 = vld [vmem:[#allocation7 + $0x88] sm:$0xff]  ;;  %v669_v2 = vld [vmem:[#allocation7 + $0x90] sm:$0xff]  ;;  %p1829_p7 = pneg %p1828_p3 }
  0x93   : > { %v1509_v1 = vpack.c.bf16 %v668_v0, %v667_v63  ;;  %v670_v3 = vld [vmem:[#allocation7 + $0x98] sm:$0xff]  ;;  %v671_v6 = vld [vmem:[#allocation7 + $0xa0] sm:$0xff]  ;;  %v672_v7 = vld [vmem:[#allocation7 + $0xa8] sm:$0xff] }
  0x94   : > { %1552 = vmatpush3.bf16.msra.mxu1 %v1549_v27  ;;  %v1513_v5 = vpack.c.bf16 %v670_v3, %v669_v2  ;;  %v1517_v9 = vpack.c.bf16 %v672_v7, %v671_v6  ;;  %v673_v10 = vld [vmem:[#allocation7 + $0xb0] sm:$0xff]  ;;  %v674_v11 = vld [vmem:[#allocation7 + $0xb8] sm:$0xff]  ;;  %v675_v13 = vld [vmem:[#allocation7 + $0xc0] sm:$0xff]  ;;  %p1836_p4 = pnand %p1835_p2, %p1829_p7 }
  0x95   : > { %1476 = vmatpush3.bf16.msra.mxu0 %v1473_v12  ;;  %1554 = vmatprep.subr.bf16.mxu1 %v1553_v35  ;;  %v1521_v12 = vpack.c.bf16 %v674_v11, %v673_v10  ;;  %v676_v14 = vld [vmem:[#allocation7 + $0xc8] sm:$0xff]  ;;  %v677_v16 = vld [vmem:[#allocation7 + $0xd0] sm:$0xff]  ;;  %v678_v17 = vld [vmem:[#allocation7 + $0xd8] sm:$0xff] }
  0x96   : > { %1478 = vmatprep.subr.bf16.mxu0 %v1477_v23  ;;  %v1525_v15 = vpack.c.bf16 %v676_v14, %v675_v13  ;;  %v1529_v18 = vpack.c.bf16 %v678_v17, %v677_v16  ;;  %v679_v19 = vld [vmem:[#allocation7 + $0xe0] sm:$0xff]  ;;  %v680_v20 = vld [vmem:[#allocation7 + $0xe8] sm:$0xff]  ;;  %v681_v25 = vld [vmem:[#allocation7 + $0xf0] sm:$0xff] }
  0x97   : > { %v1533_v21 = vpack.c.bf16 %v680_v20, %v679_v19  ;;  %v662_v22 = vld [vmem:[#allocation7 + $0x60] sm:$0xff]  ;;  %v682_v26 = vld [vmem:[#allocation7 + $0xf8] sm:$0xff]  ;;  %v664_v28 = vld [vmem:[#allocation7 + $0x70] sm:$0xff] }
  0x98   : > { %1297 = vmatmul.mubr.msk.f32.vlgmr.msra.gmra.mrb[0].mxu0 %vm374_vm0, %v2183_v30  ;;  %1556 = vmatpush3.bf16.msra.mxu1 %v1553_v35  ;;  %v1537_v27 = vpack.c.bf16 %v682_v26, %v681_v25  ;;  %v665_v29 = vld [vmem:[#allocation7 + $0x78] sm:$0xff]  ;;  %v835_v33 = vld [vmem:[#allocation7 + $0x108] sm:$0xff]  ;;  %v1171_v35 = vld [vmem:[%s2269_s2] ss:$0 sm:$0xff] }
  0x99   : > { %1480 = vmatpush3.bf16.msra.mxu0 %v1477_v23  ;;  %1315 = vmatprep.mubr.msk.f32.mxu0 %vm374_vm0, %v350_v32  ;;  %v663_v23 = vld [vmem:[#allocation7 + $0x68] sm:$0xff]  ;;  %v834_v32 = vld [vmem:[#allocation7 + $0x100] sm:$0xff]  ;;  %v836_v42 = vld [vmem:[#allocation7 + $0x110] sm:$0xff] }
  0x9a   : > { %1482 = vmatprep.subr.bf16.mxu0 %v1481_v31  ;;  %1558 = vmatprep.subr.bf16.mxu1 %v1557_v41  ;;  %v1565_v24 = vpack.c.bf16 %v663_v23, %v662_v22  ;;  %v1573_v34 = vpack.c.bf16 %v835_v33, %v834_v32  ;;  %v837_v43 = vld [vmem:[#allocation7 + $0x118] sm:$0xff]  ;;  %vm1172_vm3 = vmneg %vm345_vm1  ;;  %v839_v52 = vld [vmem:[#allocation7 + $0x128] sm:$0xff] }
  0x9b   : > { %v1577_v48 = vpack.c.bf16 %v837_v43, %v836_v42  ;;  %v842_v57 = vld [vmem:[#allocation7 + $0x140] sm:$0xff]  ;;  %v843_v58 = vld [vmem:[#allocation7 + $0x148] sm:$0xff]  ;;  %v844_v60 = vld [vmem:[#allocation7 + $0x150] sm:$0xff] }
  0x9c   : > { %1560 = vmatpush3.bf16.msra.mxu1 %v1557_v41  ;;  %v845_v61 = vld [vmem:[#allocation7 + $0x158] sm:$0xff]  ;;  %v846_v63 = vld [vmem:[#allocation7 + $0x160] sm:$0xff]  ;;  %v847_v0 = vld [vmem:[#allocation7 + $0x168] sm:$0xff] }
  0x9d   : > { %1484 = vmatpush3.bf16.msra.mxu0 %v1481_v31  ;;  %1562 = vmatprep.subr.bf16.mxu1 %v1561_v47  ;;  %v1569_v31 = vpack.c.bf16 %v665_v29, %v664_v28  ;;  %v848_v2 = vld [vmem:[#allocation7 + $0x170] sm:$0xff]  ;;  %v849_v3 = vld [vmem:[#allocation7 + $0x178] sm:$0xff]  ;;  %v928_v6 = vld [vmem:[#allocation8 + $0x8] sm:$0xff] }
  0x9e   : > { %1486 = vmatprep.subr.bf16.mxu0 %v1485_v38  ;;  %v930_v10 = vld [vmem:[#allocation8 + $0x18] sm:$0xff]  ;;  %v932_v13 = vld [vmem:[#allocation8 + $0x28] sm:$0xff]  ;;  %v1178_v23 = vld [vmem:[%s2273_s6] ss:$0 sm:$0xff] }
  0x9f   : > { %v934_v16 = vld [vmem:[#allocation8 + $0x38] sm:$0xff] }
  0xa0   : > { %1564 = vmatpush3.bf16.msra.mxu1 %v1561_v47 }
  0xa1   : > { %1488 = vmatpush3.bf16.msra.mxu0 %v1485_v38  ;;  %1566 = vmatprep.subr.bf16.mxu1 %v1565_v24 }
  0xa2   : > { %1490 = vmatprep.subr.bf16.mxu0 %v1489_v44 }
  0xa4   : > { %1568 = vmatpush3.bf16.msra.mxu1 %v1565_v24 }
  0xa5   : > { %1492 = vmatpush3.bf16.msra.mxu0 %v1489_v44  ;;  %1570 = vmatprep.subr.bf16.mxu1 %v1569_v31 }
  0xa6   : > { %1494 = vmatprep.subr.bf16.mxu0 %v1493_v51 }
  0xa8   : > { %1316 = vmatmul.mubr.msk.f32.vlgmr.msra.gmra.mrb[0].mxu0 %vm374_vm0, %v348_v54  ;;  %1572 = vmatpush3.bf16.msra.mxu1 %v1569_v31  ;;  %v840_v54 = vld [vmem:[#allocation7 + $0x130] sm:$0xff] }
  0xa9   : > { %1496 = vmatpush3.bf16.msra.mxu0 %v1493_v51  ;;  %1334 = vmatprep.mubr.msk.f32.mxu0 %vm374_vm0, %v354_v56  ;;  %v838_v51 = vld [vmem:[#allocation7 + $0x120] sm:$0xff] }
  0xaa   : > { %1498 = vmatprep.subr.bf16.mxu0 %v1497_v55  ;;  %1574 = vmatprep.subr.bf16.mxu1 %v1573_v34  ;;  %v1581_v53 = vpack.c.bf16 %v839_v52, %v838_v51 }
  0xad   : > { %1500 = vmatpush3.bf16.msra.mxu0 %v1497_v55  ;;  %v841_v55 = vld [vmem:[#allocation7 + $0x138] sm:$0xff] }
  0xae   : > { %1502 = vmatprep.subr.bf16.mxu0 %v1501_v59  ;;  %v1585_v56 = vpack.c.bf16 %v841_v55, %v840_v54 }
  0xb1   : > { %1504 = vmatpush3.bf16.msra.mxu0 %v1501_v59  ;;  %v1589_v59 = vpack.c.bf16 %v843_v58, %v842_v57 }
  0xb2   : > { %1506 = vmatprep.subr.bf16.mxu0 %v1505_v62 }
  0xb5   : > { %1508 = vmatpush3.bf16.msra.mxu0 %v1505_v62  ;;  %v1593_v62 = vpack.c.bf16 %v845_v61, %v844_v60 }
  0xb6   : > { %1510 = vmatprep.subr.bf16.mxu0 %v1509_v1 }
  0xb8   : > { %1335 = vmatmul.mubr.msk.f32.vlgmr.msra.gmra.mrb[0].mxu0 %vm374_vm0, %v356_v4  ;;  %v1601_v4 = vpack.c.bf16 %v849_v3, %v848_v2 }
  0xb9   : > { %1512 = vmatpush3.bf16.msra.mxu0 %v1509_v1  ;;  %v1597_v1 = vpack.c.bf16 %v847_v0, %v846_v63 }
  0xba   : > { %1514 = vmatprep.subr.bf16.mxu0 %v1513_v5 }
  0xbd   : > { %1516 = vmatpush3.bf16.msra.mxu0 %v1513_v5  ;;  %v927_v5 = vld [vmem:[#allocation8] sm:$0xff] }
  0xbe   : > { %1518 = vmatprep.subr.bf16.mxu0 %v1517_v9  ;;  %v1605_v7 = vpack.c.bf16 %v928_v6, %v927_v5 }
  0xc1   : > { %1520 = vmatpush3.bf16.msra.mxu0 %v1517_v9  ;;  %v929_v9 = vld [vmem:[#allocation8 + $0x10] sm:$0xff] }
  0xc2   : > { %1522 = vmatprep.subr.bf16.mxu0 %v1521_v12  ;;  %v1609_v11 = vpack.c.bf16 %v930_v10, %v929_v9 }
  0xc5   : > { %1524 = vmatpush3.bf16.msra.mxu0 %v1521_v12  ;;  %v931_v12 = vld [vmem:[#allocation8 + $0x20] sm:$0xff] }
  0xc6   : > { %1526 = vmatprep.subr.bf16.mxu0 %v1525_v15  ;;  %v1613_v14 = vpack.c.bf16 %v932_v13, %v931_v12 }
  0xc9   : > { %1528 = vmatpush3.bf16.msra.mxu0 %v1525_v15  ;;  %v933_v15 = vld [vmem:[#allocation8 + $0x30] sm:$0xff] }
  0xca   : > { %1530 = vmatprep.subr.bf16.mxu0 %v1529_v18  ;;  %v1617_v17 = vpack.c.bf16 %v934_v16, %v933_v15 }
  0xcd   : > { %1532 = vmatpush3.bf16.msra.mxu0 %v1529_v18 }
  0xce   : > { %1534 = vmatprep.subr.bf16.mxu0 %v1533_v21 }
  0xd1   : > { %1536 = vmatpush3.bf16.msra.mxu0 %v1533_v21 }
  0xd2   : > { %1538 = vmatprep.subr.bf16.mxu0 %v1537_v27 }
  0xd5   : > { %1540 = vmatpush3.bf16.msra.mxu0 %v1537_v27 }
 0x18b   : > { %v1336_v36 = vpop.f32.mrb[0].mxu0 }
 0x18c   : > { %v633_v37 = vadd.f32 %v1336_v36, %v1171_v35  ;;  %v614_v38 = vpop.f32.mrb[1].mxu0 }
 0x18d   : > { %v632_v39 = vadd.f32 %v1171_v35, %v614_v38 }
 0x18e   : > { %v635_v40 = vmax.f32 %v633_v37, 0.0 }
 0x18f   : > { %v634_v41 = vmax.f32 %v632_v39, 0.0 }
 0x190   : > { %v639_v44 = vrot.slane %v635_v40, 7  ;;  %v645_v45 = vrot.slane %v635_v40, 1 }
 0x191   : > { %v644_v46 = vrot.slane %v634_v41, 1  ;;  %1369 = vmatprep.mubr.f32.mxu0 %v634_v41  ;;  %v638_v47 = vrot.slane %v634_v41, 7 }
 0x192   : > { %1370 = vmatmul.mubr.f32.vlgmr.msra.gmra.mrb[2].mxu0 %v635_v40 }
 0x193   : > { %1404 = vmatprep.mubr.msk.f32.mxu1 %vm1172_vm3, %v638_v47  ;;  %v640_v49 = vsel %vm345_vm1, %v638_v47, %v639_v44  ;;  %v646_v50 = vsel %vm351_vm2, %v644_v46, %v645_v45 }
 0x194   : > { %1405 = vmatmul.mubr.f32.vlgmr.msra.gmra.mrb[0].mxu1 %v640_v49 }
 0x195   : > { %1576 = vmatpush3.bf16.msra.mxu1 %v1573_v34  ;;  %1439 = vmatprep.mubr.f32.mxu1 %v646_v50 }
 0x196   : > { %1578 = vmatprep.subr.bf16.mxu1 %v1577_v48 }
 0x199   : > { %1580 = vmatpush3.bf16.msra.mxu1 %v1577_v48 }
 0x19a   : > { %1582 = vmatprep.subr.bf16.mxu1 %v1581_v53 }
 0x19d   : > { %1584 = vmatpush3.bf16.msra.mxu1 %v1581_v53 }
 0x19e   : > { %1586 = vmatprep.subr.bf16.mxu1 %v1585_v56 }
 0x1a1   : > { %1588 = vmatpush3.bf16.msra.mxu1 %v1585_v56 }
 0x1a2   : > { %1590 = vmatprep.subr.bf16.mxu1 %v1589_v59 }
 0x1a5   : > { %1592 = vmatpush3.bf16.msra.mxu1 %v1589_v59 }
 0x1a6   : > { %1594 = vmatprep.subr.bf16.mxu1 %v1593_v62 }
 0x1a9   : > { %1596 = vmatpush3.bf16.msra.mxu1 %v1593_v62 }
 0x1aa   : > { %1598 = vmatprep.subr.bf16.mxu1 %v1597_v1 }
 0x1ad   : > { %1600 = vmatpush3.bf16.msra.mxu1 %v1597_v1 }
 0x1ae   : > { %1602 = vmatprep.subr.bf16.mxu1 %v1601_v4 }
 0x1b1   : > { %1604 = vmatpush3.bf16.msra.mxu1 %v1601_v4 }
 0x1b2   : > { %1606 = vmatprep.subr.bf16.mxu1 %v1605_v7 }
 0x1b4   : > { %1440 = vmatmul.mubr.msk.f32.vlgmr.msra.gmra.mrb[0].mxu1 %vm351_vm2, %v645_v45 }
 0x1b5   : > { %1608 = vmatpush3.bf16.msra.mxu1 %v1605_v7  ;;  %1458 = vmatprep.mubr.msk.f32.mxu1 %vm374_vm0, %v2177_v8  ;;  %v1177_v8 = vld [vmem:[%s2271_s4] ss:$0 sm:$0xff] }
 0x1b6   : > { %1610 = vmatprep.subr.bf16.mxu1 %v1609_v11 }
 0x1b9   : > { %1612 = vmatpush3.bf16.msra.mxu1 %v1609_v11 }
 0x1ba   : > { %1614 = vmatprep.subr.bf16.mxu1 %v1613_v14 }
 0x1bd   : > { %1616 = vmatpush3.bf16.msra.mxu1 %v1613_v14 }
 0x1be   : > { %1618 = vmatprep.subr.bf16.mxu1 %v1617_v17 }
 0x1c1   : > { %1620 = vmatpush3.bf16.msra.mxu1 %v1617_v17 }
 0x1c4   : > { %1459 = vmatmul.mubr.msk.f32.vlgmr.msra.gmra.mrb[0].mxu1 %vm374_vm0, %v2183_v30 }
 0x265   : > { %v1371_v18 = vpop.f32.mrb[2].mxu0 }
 0x266   : > { %v749_v19 = vpop.f32.mrb[3].mxu0 }
 0x297   : > { %v1460_v20 = vpop.f32.mrb[0].mxu1 }
 0x298   : > { %v1621_v21 = vadd.f32 %v1460_v20, %v1371_v18  ;;  %v1001_v22 = vpop.f32.mrb[1].mxu1 }
 0x299   : > { %v1622_v24 = vadd.f32 %v1001_v22, %v749_v19 }
 0x29a   : > { %v1020_v25 = vadd.f32 %v1621_v21, %v1177_v8 }
 0x29b   : > { %v1019_v30 = vadd.f32 %v1622_v24, %v1177_v8 }
 0x29c   : > { %v1029_v26 = vadd.f32 %v1178_v23, %v1020_v25 }
 0x29d   : > { %v1028_v27 = vadd.f32 %v1178_v23, %v1019_v30 }
 0x29e   : > { %v1031_v28 = vmax.f32 %v1029_v26, 0.0 }
 0x29f   : > { %v1030_v29 = vmax.f32 %v1028_v27, 0.0 }
 0x2a0   : > { %1033 = vst [vmem:[%s340_s12 + $0x8] sm:$0xff] %v1031_v28 }
 0x2a1   : > { %1032 = vst [vmem:[%s340_s12] sm:$0xff] %v1030_v29 }
 0x2a2   : > { %1839 = shalt.err (!%p1836_p4)
}
 0x2a3   : > { %s1840_s13 = scalar_lea.hbm %s2223_s11, 256  ;;  %s1844_s14 = scalar_lea.hbm %s2274_s7, 512 }
 0x2a4   : > { %p1841_p9 = scmp.ne.s32.totalorder %s2223_s11, %s1840_s13  ;;  %p1845_p8 = scmp.lt.u32.totalorder %s2223_s11, %s2274_s7 }
 0x2a5   : > { %p1846_p13 = scmp.lt.u32.totalorder %s1844_s14, %s1840_s13  ;;  %p1848_p10 = scmp.lt.u32.totalorder %s1840_s13, %s2223_s11 }
 0x2a6   : > { %p1842_p0 = pnand %p1841_p9, %p2105_p5 }
 0x2a7   : > { %p1847_p6 = por %p1846_p13, %p1845_p8 }
 0x2a8   : > { %p1843_p11 = pneg %p1842_p0 }
 0x2a9   : > { %p1849_p3 = por %p1848_p10, %p1847_p6 }
 0x2ab   : > { %p1850_p7 = pnand %p1849_p3, %p1843_p11 }
 0x2ad   : > { %1853 = shalt.err (!%p1850_p7)
}
 0x2ae   : > { %s1909_s16 = smov 128   ;;  %s1910_s29 = smov 8  }
 0x2af   : > { %1645 = dma.vmem_to_hbm [thread:$0]  (%p2105_p5), %s2218_s20, 256, %s2223_s11, %s1035_s23, %s1909_s16, %s1909_s16, %s1910_s29  }
 0x2b0 PF: > { %s2294_s8 = sld [smem:[#allocation15_spill]]  ;;  %s1063_s28 = sand.u32 1, %s1888_s24  }
 0x2b1   : > { %p2296_p1 = scmp.ge.s32.totalorder %s1900_s27, 2  ;;  %s1064_s30 = scalar_lea.sflag [#allocation4], %s1063_s28 }
 0x2b6   : > { %p2295_p12 = scmp.ne.s32.totalorder %s2294_s8, 0 }
 0x2b8   : > { %p1662_p2 = pnand %p2296_p1, %p2295_p12 }
 0x2ba   : > { %1883 = dma.done.wait (!%p1662_p2), %s1064_s30, 256  }
 0x2bb   : > { %1885 = vsyncadd (!%p1662_p2), %s1064_s30, 4294967040  ;;  %p22_p4 = scmp.ge.s32.totalorder %s2091_s22, 4   ;;  %s2297_s24 = smov %s1892_s25 }
 0x2bc   : > { %s2298_s25 = smov %s1896_s26  ;;  %s2299_s26 = smov %s2101_s18 }
 0x2bd   : > { %s2300_s27 = smov %s2091_s22  ;;  %24 = sbr.rel (!%p22_p4) target bundleno = 7 (0x7), region = 109 }
 0x2c4   :  { %1069 = vsyncpa [#allocation3], 1 }
 0x2c5   :  { %1071 = vsyncpa [#allocation3 + $0x1], 1 }
 0x2c6   :  { %1072 = vsyncpa [#allocation6], 1 }
 0x2c7   :  { %1073 = vsyncpa [#allocation9], 1 }
 0x2c8   :  { %1074 = vsyncpa [#allocation4], 1 }
 0x2c9   :  { %1076 = vsyncpa [#allocation4 + $0x1], 1 }

</bundles_post_ra>
